<compile_context>
chip_gen: v7x
topology: tpu7x:2x2x1
jax: 0.10.0
libtpu: 0.0.40
codegen_flags: <defaults>
</compile_context>

<pallas_src>
import jax
import jax.numpy as jnp
from jax.experimental import pallas as pl
from jax.experimental.pallas import tpu as pltpu


_FAST_PATH_MAX_ELEMS = 4096   # below this, pallas_call overhead dominates
_LANES = 512                  # lane-dim width (multiple of 128, lane-dense stores)
_MAX_TILE_ROWS = 512          # rows / grid step (multiple of 8) -> 1 MiB f32 tile


def _round_up(x, m):
    return ((x + m - 1) // m) * m


def _to_padded_2d(x, n):
    """Flatten to a sublane/lane-dense (rows, 512) f32 slab; return slab, tile rows, grid."""
    rows = max(1, pl.cdiv(n, _LANES))
    tile_rows = min(_MAX_TILE_ROWS, _round_up(rows, 8))
    rows_pad = _round_up(rows, tile_rows)
    n_pad = rows_pad * _LANES
    x = jnp.pad(x.reshape(-1), (0, n_pad - n))
    return x.reshape(rows_pad, _LANES), tile_rows, rows_pad // tile_rows


# ---------------------------------------------------------------------------
# Kernels
# ---------------------------------------------------------------------------
def _mix_vv_kernel(w_ref, d_ref, i_ref, o_ref):
    # w_ref: (1,) f32 in SMEM; d/i/o: (TR, 512) f32 tiles in VMEM.
    w = w_ref[0]
    wm = 1.0 - w                                  # hoisted scalar
    o_ref[...] = w * d_ref[...] + wm * i_ref[...]


def _mix_vs_kernel(s_ref, x_ref, o_ref):
    # s_ref: (2,) f32 in SMEM = [w_eff, scalar_loss]; x/o: (TR, 512) tiles.
    # out = w_eff * x + (1 - w_eff) * scalar_loss
    w = s_ref[0]
    bias = (1.0 - w) * s_ref[1]                   # hoisted scalar
    o_ref[...] = w * x_ref[...] + bias


# ---------------------------------------------------------------------------
# Pallas paths
# ---------------------------------------------------------------------------
def _pallas_mix_vv(w, d, i, out_shape):
    n = d.size
    d2, tile_rows, grid = _to_padded_2d(d, n)
    i2, _, _ = _to_padded_2d(i, n)
    w1 = jnp.asarray(w, jnp.float32).reshape(1)

    vec_spec = pl.BlockSpec((tile_rows, _LANES), lambda r: (r, 0))
    out2 = pl.pallas_call(
        _mix_vv_kernel,
        out_shape=jax.ShapeDtypeStruct(d2.shape, jnp.float32),
        grid=(grid,),
        in_specs=[
            pl.BlockSpec(memory_space=pltpu.MemorySpace.SMEM),  # w
            vec_spec,                                           # domain_loss
            vec_spec,                                           # intent_loss
        ],
        out_specs=vec_spec,
        input_output_aliases={1: 0},  # reuse the padded domain buffer
        compiler_params=pltpu.CompilerParams(
            dimension_semantics=("parallel",)),
    )(w1, d2, i2)
    return out2.reshape(-1)[:n].reshape(out_shape)


def _pallas_mix_vs(w_eff, x, scalar_loss, out_shape):
    # out = w_eff * x + (1 - w_eff) * scalar_loss, scalar kept in SMEM (no
    # HBM broadcast -> only 2 memory streams instead of 3).
    n = x.size
    x2, tile_rows, grid = _to_padded_2d(x, n)
    s = jnp.stack([jnp.asarray(w_eff, jnp.float32).reshape(()),
                   jnp.asarray(scalar_loss, jnp.float32).reshape(())])

    vec_spec = pl.BlockSpec((tile_rows, _LANES), lambda r: (r, 0))
    out2 = pl.pallas_call(
        _mix_vs_kernel,
        out_shape=jax.ShapeDtypeStruct(x2.shape, jnp.float32),
        grid=(grid,),
        in_specs=[
            pl.BlockSpec(memory_space=pltpu.MemorySpace.SMEM),  # [w_eff, scalar]
            vec_spec,                                           # tensor loss
        ],
        out_specs=vec_spec,
        input_output_aliases={1: 0},
        compiler_params=pltpu.CompilerParams(
            dimension_semantics=("parallel",)),
    )(s, x2)
    return out2.reshape(-1)[:n].reshape(out_shape)


# ---------------------------------------------------------------------------
# Public wrapper (matches MultiTaskLoss.forward semantics)
# ---------------------------------------------------------------------------
def multitask_loss(w, domain_loss, intent_loss, *, force_pallas=False):
    """loss = w * domain_loss + (1 - w) * intent_loss."""
    d = jnp.asarray(domain_loss, jnp.float32)
    i = jnp.asarray(intent_loss, jnp.float32)
    w = jnp.asarray(w, jnp.float32)

    out_shape = jnp.broadcast_shapes(d.shape, i.shape)
    n = 1
    for s in out_shape:
        n *= s

    # Fast path: the module's common case is two scalar losses; a pallas_call
    # (+ 3 HBM<->VMEM DMAs) is pure overhead there — let XLA fuse it.
    if not force_pallas and n <= _FAST_PATH_MAX_ELEMS:
        return w * d + (1.0 - w) * i

    # One operand is a scalar: keep it in SMEM, never broadcast it in HBM.
    if i.size == 1 and d.size > 1:
        return _pallas_mix_vs(w, d, i, out_shape)
    if d.size == 1 and i.size > 1:
        # w*d + (1-w)*i == w_eff*i + (1-w_eff)*d  with  w_eff = 1 - w
        return _pallas_mix_vs(1.0 - w, i, d, out_shape)

    # General case: two per-element loss tensors.
    d_b = jnp.broadcast_to(d, out_shape)
    i_b = jnp.broadcast_to(i, out_shape)
    return _pallas_mix_vv(w, d_b, i_b, out_shape)


if __name__ == "__main__":
    key = jax.random.PRNGKey(0)
    k1, k2 = jax.random.split(key)

    # nn.Parameter(torch.tensor(0.5))
    w = jnp.float32(0.5)

    # 1) Common case: scalar task losses (takes the fused fast path).
    d_s = jax.random.uniform(k1, (), dtype=jnp.float32) * 2.0
    i_s = jax.random.uniform(k2, (), dtype=jnp.float32) * 2.0
    out_s = jax.block_until_ready(multitask_loss(w, d_s, i_s))
    ref_s = w * d_s + (1.0 - w) * i_s
    assert out_s.shape == ref_s.shape
    assert jnp.allclose(out_s, ref_s, rtol=1e-6, atol=1e-6), (out_s, ref_s)

    # 2) Per-example (unreduced) losses through the tiled Pallas kernel.
    d_v = jax.random.uniform(k1, (2, 8, 32), dtype=jnp.float32)
    i_v = jax.random.uniform(k2, (2, 8, 32), dtype=jnp.float32)
    out_v = jax.block_until_ready(multitask_loss(w, d_v, i_v, force_pallas=True))
    ref_v = w * d_v + (1.0 - w) * i_v
    assert out_v.shape == ref_v.shape
    assert jnp.allclose(out_v, ref_v, rtol=1e-6, atol=1e-6)

    # 3) Tensor domain loss + scalar intent loss (scalar stays in SMEM).
    out_m = jax.block_until_ready(multitask_loss(w, d_v, i_s, force_pallas=True))
    ref_m = w * d_v + (1.0 - w) * i_s
    assert jnp.allclose(out_m, ref_m, rtol=1e-6, atol=1e-6)

    # 4) Scalar domain loss + tensor intent loss (swapped roles).
    out_m2 = jax.block_until_ready(multitask_loss(w, d_s, i_v, force_pallas=True))
    ref_m2 = w * d_s + (1.0 - w) * i_v
    assert jnp.allclose(out_m2, ref_m2, rtol=1e-6, atol=1e-6)

    print("KERNEL_OK")
</pallas_src>

<mosaic_0001>
module attributes {stable_mosaic.version = 11 : i64} {
  func.func @_mix_vv_kernel(%arg0: i32, %arg1: memref<1xf32, #tpu.memory_space<smem>>, %arg2: memref<8x512xf32, #tpu.memory_space<vmem>>, %arg3: memref<8x512xf32, #tpu.memory_space<vmem>>, %arg4: memref<8x512xf32, #tpu.memory_space<vmem>>) attributes {dimension_semantics = [#tpu.dimension_semantics<parallel>], iteration_bounds = array<i64: 1>, scalar_prefetch = 0 : i64, scratch_operands = 0 : i64, tpu.core_type = #tpu.core_type<tc>, window_params = [{transform_indices = @transform_0, window_bounds = array<i64: 1>}, {transform_indices = @transform_1, window_bounds = array<i64: 8, 512>}, {transform_indices = @transform_2, window_bounds = array<i64: 8, 512>}, {transform_indices = @transform_3, window_bounds = array<i64: 8, 512>}]} {
    %c0 = arith.constant 0 : index
    %0 = memref.load %arg1[%c0] : memref<1xf32, #tpu.memory_space<smem>>
    %cst = arith.constant 1.000000e+00 : f32
    %1 = arith.subf %cst, %0 : f32
    %c0_0 = arith.constant 0 : index
    %c0_1 = arith.constant 0 : index
    %2 = vector.load %arg2[%c0_0, %c0_1] : memref<8x512xf32, #tpu.memory_space<vmem>>, vector<8x512xf32>
    %3 = vector.broadcast %0 : f32 to vector<8x512xf32>
    %4 = arith.mulf %3, %2 : vector<8x512xf32>
    %c0_2 = arith.constant 0 : index
    %c0_3 = arith.constant 0 : index
    %5 = vector.load %arg3[%c0_2, %c0_3] : memref<8x512xf32, #tpu.memory_space<vmem>>, vector<8x512xf32>
    %6 = vector.broadcast %1 : f32 to vector<8x512xf32>
    %7 = arith.mulf %6, %5 : vector<8x512xf32>
    %8 = arith.addf %4, %7 : vector<8x512xf32>
    %c0_4 = arith.constant 0 : index
    %c0_5 = arith.constant 0 : index
    %9 = vector.load %arg4[%c0_4, %c0_5] : memref<8x512xf32, #tpu.memory_space<vmem>>, vector<8x512xf32>
    tpu.vector_store %arg4[%c0_4, %c0_5], %8 {strides = array<i32>} : memref<8x512xf32, #tpu.memory_space<vmem>>, vector<8x512xf32>,
    return
  }
  func.func @transform_0(%arg0: i32) -> i32 {
    %c0_i32 = arith.constant 0 : i32
    %c0_i32_0 = arith.constant 0 : i32
    return %c0_i32 : i32
  }
  func.func @transform_1(%arg0: i32) -> (i32, i32) {
    %c0_i32 = arith.constant 0 : i32
    %c0_i32_0 = arith.constant 0 : i32
    return %arg0, %c0_i32 : i32, i32
  }
  func.func @transform_2(%arg0: i32) -> (i32, i32) {
    %c0_i32 = arith.constant 0 : i32
    %c0_i32_0 = arith.constant 0 : i32
    return %arg0, %c0_i32 : i32, i32
  }
  func.func @transform_3(%arg0: i32) -> (i32, i32) {
    %c0_i32 = arith.constant 0 : i32
    %c0_i32_0 = arith.constant 0 : i32
    return %arg0, %c0_i32 : i32, i32
  }
}

</mosaic_0001>

<bundles_post_ra>
// kernel: tpu_custom_call.1
= control target key start
LH: loop header
LB: loop body
LE: loop exit
PB: predicated region body
PF: predicated region fallthrough
CT: control target
= control target key end

     0   :  { %9 = vsyncpa [#allocation4], 0  ;;  %s185_s0 = inlined_call_operand.<no memory space> [shape: f32[1], index: 0, kind: input, shape index: {}]   ;;  %s186_s1 = inlined_call_operand.hbm [shape: f32[8,512], index: 1, kind: input, shape index: {}, may-alias: {1,3}]   ;;  %s187_s2 = inlined_call_operand.vmem [shape: f32[8,512], index: 2, kind: input, shape index: {}]   ;;  %s188_s3 = inlined_call_operand.hbm [shape: f32[8,512], index: 3, kind: output, shape index: {}, may-alias: {1,3}]  }
   0x1   :  { %10 = vsyncpa [#allocation5], 0  ;;  %s121_s12 = smov [#allocation3]   ;;  %s73_s16 = scalar_lea.hbm %s186_s1, 512 }
   0x2   :  { %s19_s13 = sshll.u32 %s121_s12, 4  ;;  %p74_p0 = scmp.ne.s32.totalorder %s186_s1, %s73_s16  ;;  %s20_s13 = int_to_ptr.vmem [resolvable:$true] %s19_s13 }
   0x3   :  { %p77_p1 = scmp.lt.u32.totalorder %s73_s16, %s186_s1 }
   0x5   :  { %p79_p2 = pnand %p77_p1, %p74_p0 }
   0x7   :  { %82 = shalt.err (!%p79_p2)
}
   0x8   :  { %s83_s21 = scalar_lea.vmem %s20_s13, 512  ;;  %p88_p4 = scmp.lt.s32.totalorder %s20_s13, %s20_s13 }
   0x9   :  { %p84_p3 = scmp.ne.s32.totalorder %s20_s13, %s83_s21  ;;  %p89_p5 = scmp.lt.s32.totalorder %s83_s21, %s83_s21 }
   0xb   :  { %p90_p6 = por %p89_p5, %p88_p4 }
   0xd   :  { %p91_p7 = pnand %p90_p6, %p84_p3 }
   0xf   :  { %94 = shalt.err (!%p91_p7)
}
  0x10   :  { %22 = dma.hbm_to_vmem [thread:$0]  %s186_s1, 512, %s20_s13, [#allocation4]  }
  0x11   :  { %117 = dma.done.wait [#allocation4], 512  }
  0x12   :  { %118 = vsyncadd [#allocation4], 4294966784  ;;  %s29_s26 = ssub.f32 1.0, %s185_s0  ;;  %v34_v0 = vstv %s185_s0  ;;  %v30_v2 = vld [vmem:[#allocation3] sm:$0xff]  ;;  %v31_v4 = vld [vmem:[#allocation3 + $0x8] sm:$0xff]  ;;  %s122_s8 = smov [#allocation6]  }
  0x13   :  { %v39_v3 = vld [vmem:[%s187_s2] sm:$0xff]  ;;  %v35_v5 = vmul.f32 %v34_v0, %v30_v2  ;;  %v36_v7 = vmul.f32 %v34_v0, %v31_v4  ;;  %v40_v8 = vld [vmem:[%s187_s2 + $0x8] sm:$0xff]  ;;  %v32_v9 = vld [vmem:[#allocation3 + $0x10] sm:$0xff]  ;;  %s62_s9 = sshll.u32 %s122_s8, 4  ;;  %s63_s9 = int_to_ptr.vmem [resolvable:$true] %s62_s9 }
  0x14   :  { %v43_v1 = vstv %s29_s26  ;;  %v41_v10 = vld [vmem:[%s187_s2 + $0x10] sm:$0xff]  ;;  %v37_v12 = vmul.f32 %v34_v0, %v32_v9  ;;  %v33_v14 = vld [vmem:[#allocation3 + $0x18] sm:$0xff]  ;;  %s95_s10 = scalar_lea.vmem %s63_s9, 512  ;;  %p100_p9 = scmp.lt.s32.totalorder %s63_s9, %s63_s9 }
  0x15   :  { %v44_v6 = vmul.f32 %v43_v1, %v39_v3  ;;  %v45_v11 = vmul.f32 %v43_v1, %v40_v8  ;;  %v46_v13 = vmul.f32 %v43_v1, %v41_v10  ;;  %v42_v15 = vld [vmem:[%s187_s2 + $0x18] sm:$0xff]  ;;  %v38_v17 = vmul.f32 %v34_v0, %v33_v14  ;;  %p96_p8 = scmp.ne.s32.totalorder %s63_s9, %s95_s10  ;;  %p101_p10 = scmp.lt.s32.totalorder %s95_s10, %s95_s10 }
  0x16   :  { %v47_v18 = vmul.f32 %v43_v1, %v42_v15 }
  0x17   :  { %v48_v16 = vadd.f32 %v44_v6, %v35_v5  ;;  %v49_v19 = vadd.f32 %v45_v11, %v36_v7  ;;  %v50_v20 = vadd.f32 %v46_v13, %v37_v12  ;;  %p102_p11 = por %p101_p10, %p100_p9 }
  0x18   :  { %v51_v21 = vadd.f32 %v47_v18, %v38_v17 }
  0x19   :  { %52 = vst [vmem:[#allocation6] sm:$0xff] %v48_v16  ;;  %53 = vst [vmem:[#allocation6 + $0x8] sm:$0xff] %v49_v19  ;;  %p103_p12 = pnand %p102_p11, %p96_p8 }
  0x1a   :  { %54 = vst [vmem:[#allocation6 + $0x10] sm:$0xff] %v50_v20  ;;  %55 = vst [vmem:[#allocation6 + $0x18] sm:$0xff] %v51_v21 }
  0x1b   :  { %106 = shalt.err (!%p103_p12)
}
  0x1c   :  { %s107_s12 = scalar_lea.hbm %s188_s3, 512 }
  0x1d   :  { %p108_p13 = scmp.ne.s32.totalorder %s188_s3, %s107_s12  ;;  %p111_p0 = scmp.lt.u32.totalorder %s107_s12, %s188_s3 }
  0x1f   :  { %p113_p1 = pnand %p111_p0, %p108_p13 }
  0x21   :  { %116 = shalt.err (!%p113_p1)
}
  0x22   :  { %65 = dma.vmem_to_hbm [thread:$0]  %s63_s9, 512, %s188_s3, [#allocation5]  }
  0x23   :  { %119 = dma.done.wait [#allocation5], 512  }
  0x24   :  { %120 = vsyncadd [#allocation5], 4294966784 }
  0x25   :  { %69 = vsyncpa [#allocation4], 1 }
  0x26   :  { %70 = vsyncpa [#allocation5], 1 }

</bundles_post_ra>
